<compile_context>
chip_gen: v7x
topology: tpu7x:2x2x1
jax: 0.10.0
libtpu: 0.0.40
codegen_flags: <defaults>
</compile_context>

<pallas_src>
import functools

import jax
import jax.numpy as jnp
from jax.experimental import pallas as pl
from jax.experimental.pallas import tpu as pltpu


def _conv1x1_bn_relu_kernel(w_ref, x_ref, b_ref, o_ref, *, compute_dtype):
    # w_ref: (t_co, Cin)  compute_dtype (BN-scale already folded in)
    # x_ref: (Cin, t_hw)  f32 — cast here so HBM only ever carries the original f32 once
    # b_ref: (t_co, 1)    f32 (folded BN bias), broadcast over lanes
    # o_ref: (t_co, t_hw) out_dtype
    x = x_ref[...].astype(compute_dtype)
    acc = jnp.dot(w_ref[...], x, preferred_element_type=jnp.float32)
    o_ref[...] = jnp.maximum(acc + b_ref[...], 0.0).astype(o_ref.dtype)


def _vmem_budget_bytes():
    """~3/4 of physical VMEM: ~96 MiB on v5e/v6e (128 MiB), ~48 MiB on v7x (64 MiB)."""
    try:
        cap = int(pltpu.get_tpu_info().vmem_capacity_bytes)
    except Exception:
        cap = 64 * 2**20  # conservative fallback (safe on every generation)
    return (cap * 3) // 4


def _pick_tiles(N, Cin, Cout, HW, x_item, w_item, o_item, vmem_budget,
                co_align=256, t_hw_cap=8192):
    """Choose (t_co, t_hw) so double-buffered blocks fit the VMEM budget."""
    # ---- Cout tile: whole weight resident when small, else multiples of co_align
    # (256 feeds the 2x256x256 MXU on v6e/v7x and is also a multiple of 128 for v5e).
    t_co = Cout if Cout <= 2 * co_align else 2 * co_align

    def _fixed_and_per_col(tc):
        fixed = 2 * tc * Cin * w_item + 2 * tc * 128 * 4       # dbl-buf weight + padded bias
        per_col = 2 * Cin * x_item + 2 * tc * o_item           # dbl-buf x/out per lane column
        return fixed, per_col

    fixed, per_col = _fixed_and_per_col(t_co)
    while vmem_budget - fixed < 128 * per_col and t_co > co_align:
        t_co = max(co_align, t_co // 2)
        fixed, per_col = _fixed_and_per_col(t_co)

    # ---- spatial tile: largest lane-dense tile that fits the remaining budget.
    avail = vmem_budget - fixed
    t_hw = max(128, avail // per_col)
    t_hw = min(t_hw, t_hw_cap, HW)
    if t_hw < HW:
        t_hw = max(128, (t_hw // 128) * 128)   # lane-dense unless covering the full extent
    else:
        t_hw = HW

    # ---- keep >= ~4 parallel grid points so v7x's 2 TensorCores have work to shard.
    n_co = -(-Cout // t_co)
    while (N * n_co * (-(-HW // t_hw)) < 4) and t_hw > 128 and t_hw % 256 == 0:
        t_hw //= 2

    return t_co, t_hw


def conv1x1_bn_relu(x_nchw, weight, gamma, beta, running_mean, running_var,
                    *, stride=1, eps=1e-5,
                    compute_dtype=jnp.bfloat16, out_dtype=jnp.bfloat16):
    """Equivalent of Conv1x1.forward (conv 1x1 no-bias + eval-mode BN + ReLU).

    x_nchw : (N, Cin, H, W) float32
    weight : (Cout, Cin, 1, 1) float32   (PyTorch conv weight layout)
    gamma, beta, running_mean, running_var : (Cout,) float32
    """
    if stride > 1:
        # TODO(synk): this is an extra strided-gather HBM pass; fold into the kernel.
        x_nchw = x_nchw[:, :, ::stride, ::stride]

    N, Cin, H, W = x_nchw.shape
    Cout = weight.shape[0]
    HW = H * W

    # Fold BN (eval mode) into the conv weight along Cout, in f32; cast only the result.
    scale = gamma / jnp.sqrt(running_var + eps)                  # (Cout,)
    bias = beta - running_mean * scale                           # (Cout,)
    w2d = (weight.reshape(Cout, Cin) * scale[:, None]).astype(compute_dtype)
    bias2d = bias.reshape(Cout, 1).astype(jnp.float32)

    # NCHW -> (N, Cin, HW): contiguous reshape, no transpose, no dtype pass.
    x3d = x_nchw.reshape(N, Cin, HW)

    x_item = jnp.dtype(x3d.dtype).itemsize
    w_item = jnp.dtype(compute_dtype).itemsize
    o_item = jnp.dtype(out_dtype).itemsize

    vmem_budget = _vmem_budget_bytes()
    t_co, t_hw = _pick_tiles(N, Cin, Cout, HW, x_item, w_item, o_item, vmem_budget)

    grid = (N, pl.cdiv(Cout, t_co), pl.cdiv(HW, t_hw))

    cost = pl.CostEstimate(
        flops=2 * N * HW * Cin * Cout,
        transcendentals=0,
        bytes_accessed=(N * Cin * HW * x_item        # x read once, in its native f32
                        + Cout * Cin * w_item        # folded weight
                        + Cout * 4                   # folded bias
                        + N * Cout * HW * o_item),   # output write (bf16 by default)
    )

    kernel = functools.partial(_conv1x1_bn_relu_kernel, compute_dtype=compute_dtype)

    out3d = pl.pallas_call(
        kernel,
        out_shape=jax.ShapeDtypeStruct((N, Cout, HW), out_dtype),
        grid_spec=pltpu.PrefetchScalarGridSpec(
            num_scalar_prefetch=0,
            grid=grid,
            in_specs=[
                # Weight tile: invariant across the N / HW grid axes (resident when
                # the Cout axis has a single tile).
                pl.BlockSpec((t_co, Cin), lambda n, c, j: (c, 0)),
                # Activation tile (batch dim squeezed); stays f32, cast in-kernel.
                pl.BlockSpec((None, Cin, t_hw), lambda n, c, j: (n, 0, j)),
                # Folded BN bias.
                pl.BlockSpec((t_co, 1), lambda n, c, j: (c, 0)),
            ],
            out_specs=pl.BlockSpec((None, t_co, t_hw), lambda n, c, j: (n, c, j)),
        ),
        compiler_params=pltpu.CompilerParams(
            # Cin is un-tiled => no reduction axis; every grid point writes a disjoint
            # output block, so all axes are safe to shard across cores.
            dimension_semantics=("parallel", "parallel", "parallel"),
            vmem_limit_bytes=int(vmem_budget),
        ),
        cost_estimate=cost,
    )(w2d, x3d, bias2d)

    # (N, Cout, HW) -> NCHW, free reshape.
    return out3d.reshape(N, Cout, H, W)


def _reference(x_nchw, weight, gamma, beta, running_mean, running_var,
               *, stride=1, eps=1e-5):
    if stride > 1:
        x_nchw = x_nchw[:, :, ::stride, ::stride]
    N, Cin, H, W = x_nchw.shape
    Cout = weight.shape[0]
    w2d = weight.reshape(Cout, Cin)
    y = jnp.einsum('nchw,oc->nohw', x_nchw, w2d)
    scale = gamma / jnp.sqrt(running_var + eps)
    bias = beta - running_mean * scale
    y = y * scale[None, :, None, None] + bias[None, :, None, None]
    return jnp.maximum(y, 0.0)


if __name__ == "__main__":
    key = jax.random.PRNGKey(0)
    k_x, k_w, k_g, k_b, k_m, k_v = jax.random.split(key, 6)

    N, Cin, H, W = 2, 4, 16, 16
    Cout = 8

    x = jax.random.normal(k_x, (N, Cin, H, W), dtype=jnp.float32)
    weight = jax.random.normal(k_w, (Cout, Cin, 1, 1), dtype=jnp.float32) * 0.1
    gamma = 1.0 + 0.1 * jax.random.normal(k_g, (Cout,), dtype=jnp.float32)
    beta = 0.1 * jax.random.normal(k_b, (Cout,), dtype=jnp.float32)
    running_mean = 0.1 * jax.random.normal(k_m, (Cout,), dtype=jnp.float32)
    running_var = jnp.abs(jax.random.normal(k_v, (Cout,), dtype=jnp.float32)) + 0.5

    ref = _reference(x, weight, gamma, beta, running_mean, running_var)

    # fp32 compute / fp32 output path: tight tolerance.
    out_f32 = conv1x1_bn_relu(x, weight, gamma, beta, running_mean, running_var,
                              compute_dtype=jnp.float32, out_dtype=jnp.float32)
    out_f32 = jax.block_until_ready(out_f32)
    assert out_f32.shape == (N, Cout, H, W), out_f32.shape
    assert jnp.allclose(out_f32, ref, atol=1e-5, rtol=1e-5), "fp32 mismatch vs reference"

    # default bf16 compute / bf16 output path (bandwidth-optimal): loosened tolerance.
    out_bf16 = conv1x1_bn_relu(x, weight, gamma, beta, running_mean, running_var)
    out_bf16 = jax.block_until_ready(out_bf16)
    assert out_bf16.shape == (N, Cout, H, W), out_bf16.shape
    assert jnp.allclose(out_bf16.astype(jnp.float32), ref, atol=2e-2, rtol=2e-2), \
        "bf16 mismatch vs reference"

    print("KERNEL_OK")
</pallas_src>

<mosaic_0001>
module attributes {stable_mosaic.version = 11 : i64} {
  func.func @_conv1x1_bn_relu_kernel(%arg0: i32, %arg1: i32, %arg2: i32, %arg3: memref<8x4xf32, #tpu.memory_space<vmem>>, %arg4: memref<1x4x128xf32, #tpu.memory_space<vmem>>, %arg5: memref<8x1xf32, #tpu.memory_space<vmem>>, %arg6: memref<1x8x128xf32, #tpu.memory_space<vmem>>) attributes {dimension_semantics = [#tpu.dimension_semantics<parallel>, #tpu.dimension_semantics<parallel>, #tpu.dimension_semantics<parallel>], iteration_bounds = array<i64: 2, 1, 2>, scalar_prefetch = 0 : i64, scratch_operands = 0 : i64, tpu.core_type = #tpu.core_type<tc>, window_params = [{transform_indices = @transform_0, window_bounds = array<i64: 8, 4>}, {transform_indices = @transform_1, window_bounds = array<i64: 1, 4, 128>}, {transform_indices = @transform_2, window_bounds = array<i64: 8, 1>}, {transform_indices = @transform_3, window_bounds = array<i64: 1, 8, 128>}]} {
    %c0 = arith.constant 0 : index
    %c0_0 = arith.constant 0 : index
    %c0_1 = arith.constant 0 : index
    %0 = vector.load %arg4[%c0, %c0_0, %c0_1] : memref<1x4x128xf32, #tpu.memory_space<vmem>>, vector<1x4x128xf32>
    %1 = vector.shape_cast %0 : vector<1x4x128xf32> to vector<4x128xf32>
    %c0_2 = arith.constant 0 : index
    %c0_3 = arith.constant 0 : index
    %2 = vector.load %arg3[%c0_2, %c0_3] : memref<8x4xf32, #tpu.memory_space<vmem>>, vector<8x4xf32>
    %cst = arith.constant dense<0.000000e+00> : vector<8x128xf32>
    %3 = tpu.matmul %2, %1, %cst {dimension_numbers = #tpu.dot_dimension_numbers<[1], [0], [0], [1], [0, 0, 1, 1], [], []>} : vector<8x4xf32>, vector<4x128xf32>, vector<8x128xf32> -> vector<8x128xf32>
    %c0_4 = arith.constant 0 : index
    %c0_5 = arith.constant 0 : index
    %4 = vector.load %arg5[%c0_4, %c0_5] : memref<8x1xf32, #tpu.memory_space<vmem>>, vector<8x1xf32>
    %5 = vector.broadcast %4 : vector<8x1xf32> to vector<8x128xf32>
    %6 = arith.addf %3, %5 : vector<8x128xf32>
    %cst_6 = arith.constant 0.000000e+00 : f32
    %7 = vector.broadcast %cst_6 : f32 to vector<8x128xf32>
    %8 = arith.maximumf %6, %7 : vector<8x128xf32>
    %c0_7 = arith.constant 0 : index
    %c0_8 = arith.constant 0 : index
    %c0_9 = arith.constant 0 : index
    %9 = vector.load %arg6[%c0_7, %c0_8, %c0_9] : memref<1x8x128xf32, #tpu.memory_space<vmem>>, vector<1x8x128xf32>
    %10 = vector.shape_cast %9 : vector<1x8x128xf32> to vector<8x128xf32>
    %11 = vector.shape_cast %8 : vector<8x128xf32> to vector<1x8x128xf32>
    tpu.vector_store %arg6[%c0_7, %c0_8, %c0_9], %11 {strides = array<i32>} : memref<1x8x128xf32, #tpu.memory_space<vmem>>, vector<1x8x128xf32>,
    return
  }
  func.func @transform_0(%arg0: i32, %arg1: i32, %arg2: i32) -> (i32, i32) {
    %c0_i32 = arith.constant 0 : i32
    %c0_i32_0 = arith.constant 0 : i32
    return %arg1, %c0_i32 : i32, i32
  }
  func.func @transform_1(%arg0: i32, %arg1: i32, %arg2: i32) -> (i32, i32, i32) {
    %c0_i32 = arith.constant 0 : i32
    %c0_i32_0 = arith.constant 0 : i32
    return %arg0, %c0_i32, %arg2 : i32, i32, i32
  }
  func.func @transform_2(%arg0: i32, %arg1: i32, %arg2: i32) -> (i32, i32) {
    %c0_i32 = arith.constant 0 : i32
    %c0_i32_0 = arith.constant 0 : i32
    return %arg1, %c0_i32 : i32, i32
  }
  func.func @transform_3(%arg0: i32, %arg1: i32, %arg2: i32) -> (i32, i32, i32) {
    %c0_i32 = arith.constant 0 : i32
    return %arg0, %arg1, %arg2 : i32, i32, i32
  }
}

</mosaic_0001>

<bundles_post_ra>
// kernel: tpu_custom_call.1
= control target key start
LH: loop header
LB: loop body
LE: loop exit
PB: predicated region body
PF: predicated region fallthrough
CT: control target
= control target key end

     0   :  { %8 = vsyncpa [#allocation3], 0  ;;  %s818_s0 = inlined_call_operand.vmem [shape: f32[8,4], index: 0, kind: input, shape index: {}]   ;;  %s819_s1 = inlined_call_operand.vmem [shape: f32[2,4,256], index: 1, kind: input, shape index: {}]   ;;  %s820_s2 = inlined_call_operand.vmem [shape: f32[8,1], index: 2, kind: input, shape index: {}]   ;;  %s821_s3 = inlined_call_operand.hbm [shape: f32[2,8,256], index: 3, kind: output, shape index: {}]  }
   0x1   :  { %10 = vsyncpa [#allocation3 + $0x1], 0  ;;  %s675_s12 = smov 0   ;;  %s677_s13 = smov 0  }
   0x2   :  { %s679_s14 = smov 0   ;;  %s681_s15 = smov 0  }
   0x3   :  { %s683_s16 = smov 0   ;;  %s685_s17 = smov 0  }
   0x4   :  { %s687_s18 = smov 0   ;;  %s689_s19 = smov 0  }
   0x5 LB: > { %s456_s20 = sadd.s32 4294967295, %s649_s19   ;;  %s457_s21 = sadd.s32 4294967294, %s649_s19   ;;  %s649_s19 = sphi %s689_s19, %s16_s19   ;;  %s645_s18 = sphi %s687_s18, %s830_s18   ;;  %s641_s17 = sphi %s685_s17, %s829_s17   ;;  %s637_s16 = sphi %s683_s16, %s828_s16   ;;  %s633_s15 = sphi %s681_s15, %s827_s15   ;;  %s629_s14 = sphi %s679_s14, %s826_s14   ;;  %s625_s13 = sphi %s677_s13, %s825_s13   ;;  %s621_s12 = sphi %s675_s12, %s824_s12  }
   0x6   : > { %s28_s22 = sadd.s32 1, %s641_s17  ;;  %s35_s23 = sadd.s32 1, %s645_s18 }
   0x7   : > { %p29_p0 = scmp.ge.s32.totalorder %s28_s22, 2  ;;  %p136_p1 = scmp.ne.s32.totalorder %s629_s14, %s625_s13 }
   0x8   : > { %p137_p2 = scmp.eq.s32.totalorder %s456_s20, 3  ;;  %p142_p5 = scmp.ne.s32.totalorder %s625_s13, %s621_s12 }
   0x9   : > { %s832_s22 = smov (%p29_p0, %s28_s22), 0  ;;  %s834_s23 = smov (!%p29_p0, %s35_s23), %s645_s18 }
   0xa   : > { %s122_s24 = ssub.s32 %s641_s17, %s832_s22  ;;  %p726_p3 = por %p137_p2, %p136_p1 }
   0xb   : > { %p37_p4 = scmp.ge.s32.totalorder %s834_s23, 2  ;;  %p143_p6 = scmp.eq.s32.totalorder %s457_s21, 3 }
   0xc   : > { %p462_p7 = scmp.ge.s32.totalorder %s649_s19, 1  ;;  %p186_p9 = scmp.lt.s32.totalorder %s649_s19, 5 }
   0xd   : > { %s836_s23 = smov (%p37_p4, %s834_s23), 0  ;;  %p735_p8 = por %p143_p6, %p142_p5 }
   0xe   : > { %s119_s27 = ssub.s32 %s645_s18, %s836_s23  ;;  %s126_s28 = sadd.s32 1, %s629_s14 }
   0xf   : > { %s123_s29 = sor.u32 %s122_s24, %s119_s27  ;;  %p187_p10 = pnand %p462_p7, %p186_p9 }
  0x10   : > { %p124_p11 = scmp.eq.s32.totalorder %s123_s29, 0  ;;  %p225_p12 = scmp.lt.s32.totalorder (!%p187_p10), %s637_s16, 1  ;;  %v651_v0 = vmov (!%p187_p10), 0.0   ;;  %vm652_vm0 = vmmov (!%p187_p10), 0   ;;  %v239_v1 = vld [vmem:[%s820_s2] sm:$0xff] (!%p187_p10)  ;;  %v653_v2 = vmov (!%p187_p10), 0  }
  0x11   : > { %190 = sbr.rel (%p187_p10) target bundleno = 262 (0x106), region = 32  ;;  %p227_p13 = scmp.lt.s32.totalorder (!%p187_p10), %s633_s15, 1  ;;  %475 = vmatprep.subr.mxu0 (!%p187_p10), %v651_v0  ;;  %477 = vmatprep.mubr.msk.f32.mxu0 (!%p187_p10), %vm652_vm0, %v651_v0  ;;  %vm249_vm1 = vcmask (!%p187_p10), 1043456   ;;  %v238_v3 = vld [vmem:[%s818_s0] sm:$0xff] (!%p187_p10)  ;;  %vm245_vm2 = vcmask (!%p187_p10), 31744  }
  0x12   : > { %s744_s30 = scalar_select %p124_p11, %s629_s14, %s126_s28  }
  0x13   : > { %554 = vset.pattern.permute.xlu0 (!%p187_p10), %v653_v2  ;;  %s218_s28 = sand.u32 (!%p187_p10), 1, %s625_s13   ;;  %s469_s4 = sshll.u32 (!%p187_p10), %s637_s16, 1 }
  0x14   : > { %242 = vperm.xlu0 (!%p187_p10), %554, %v239_v1   ;;  %s463_s29 = sshll.u32 (!%p187_p10), %s218_s28, 3  ;;  %s339_s5 = sadd.s32 (!%p187_p10), %s633_s15, %s469_s4 }
  0x15   : > { %s654_s20 = smov (!%p187_p10), [#allocation2]  }
  0x18   : > { %s226_s6 = scalar_select %p225_p12, %s637_s16, 1 }
  0x19   : > { %s228_s7 = scalar_select %p227_p13, %s633_s15, 1 }
  0x1a   : > { %s464_s8 = sshll.u32 %s226_s6, 1  ;;  %s470_s6 = sshll.u32 %s339_s5, 7 }
  0x1b   : > { %s230_s9 = sadd.s32 %s464_s8, %s228_s7  ;;  %s220_s7 = scalar_lea.vmem [#allocation2], %s463_s29 }
  0x1c   : > { %s465_s10 = sshll.u32 %s230_s9, 2  ;;  %s343_s8 = sshll.u32 %s220_s7, 4  ;;  %s767_s8 = int_to_ptr.vmem [resolvable:$true] %s343_s8 }
  0x1d   : > { %s232_s21 = scalar_lea.vmem %s819_s1, %s465_s10  ;;  %s765_s11 = scalar_lea.hbm %s821_s3, %s470_s6 }
  0x1e   : > { %v237_v4 = vld [vmem:[%s232_s21] sm:$0xf]  ;;  %s326_s15 = scalar_lea.sflag [#allocation3], %s218_s28  ;;  %s555_s16 = scalar_lea.vmem %s767_s8, 128 }
  0x1f   : > { %476 = vmatpush3.msk.msra.mxu0 %vm249_vm1, %v237_v4  ;;  %p556_p0 = scmp.ne.s32.totalorder %s767_s8, %s555_s16  ;;  %s559_s21 = sshll.u32 %s654_s20, 4  ;;  %s560_s21 = int_to_ptr.vmem [resolvable:$false] %s559_s21 }
  0x20   : > { %478 = vmatmul.mubr.msk.f32.vlgmr.msra.gmra.mrb[0].mxu0 %vm245_vm2, %v238_v3  ;;  %s561_s24 = scalar_lea.vmem %s560_s21, 256  ;;  %p562_p4 = scmp.lt.s32.totalorder %s767_s8, %s560_s21 }
  0x21   : > { %p557_p1 = pnand %p556_p0, %p726_p3  ;;  %p563_p5 = scmp.lt.s32.totalorder %s561_s24, %s555_s16 }
  0x23   : > { %p558_p2 = pneg %p557_p1  ;;  %p564_p6 = por %p563_p5, %p562_p4 }
  0x25   : > { %p565_p7 = pnand %p564_p6, %p558_p2 }
  0x93   : > { %v243_v5 = vpop.permute.xlu0 %242 }
  0xf3   : > { %v319_v6 = vpop.f32.mrb[0].mxu0 }
  0xf4   : > { %v320_v7 = vadd.f32 %v319_v6, %v243_v5  ;;  %v479_v8 = vpop.f32.mrb[1].mxu0 }
  0xf6   : > { %v323_v9 = vmax.f32 %v320_v7, 0.0 }
  0xf8   : > { %324 = vst [vmem:[%s220_s7] sm:$0xff] %v323_v9 }
  0xf9   : > { %568 = shalt.err (!%p565_p7)
}
  0xfa   : > { %s569_s27 = scalar_lea.hbm %s765_s11, 128  ;;  %s573_s4 = scalar_lea.hbm %s821_s3, 512 }
  0xfb   : > { %p570_p9 = scmp.ne.s32.totalorder %s765_s11, %s569_s27  ;;  %p574_p12 = scmp.lt.u32.totalorder %s765_s11, %s821_s3 }
  0xfc   : > { %p575_p13 = scmp.lt.u32.totalorder %s573_s4, %s569_s27  ;;  %p577_p1 = scmp.lt.u32.totalorder %s569_s27, %s765_s11 }
  0xfd   : > { %p571_p10 = pnand %p570_p9, %p726_p3 }
  0xfe   : > { %p576_p0 = por %p575_p13, %p574_p12 }
  0xff   : > { %p572_p11 = pneg %p571_p10 }
 0x100   : > { %p578_p2 = por %p577_p1, %p576_p0 }
 0x102   : > { %p579_p4 = pnand %p578_p2, %p572_p11 }
 0x104   : > { %582 = shalt.err (!%p579_p4)
}
 0x105   : > { %480 = dma.vmem_to_hbm [thread:$0]  (%p726_p3), %s767_s8, 128, %s765_s11, %s326_s15  }
 0x106 PF: > { %p486_p5 = scmp.ge.s32.totalorder %s649_s19, 2  ;;  %s355_s7 = sand.u32 1, %s621_s12  }
 0x107   : > { %s356_s9 = scalar_lea.sflag [#allocation3], %s355_s7 }
 0x108   : > { %p483_p6 = pnand %p486_p5, %p735_p8 }
 0x10a   : > { %616 = dma.done.wait (!%p483_p6), %s356_s9, 128  }
 0x10b   : > { %618 = vsyncadd (!%p483_p6), %s356_s9, 4294967168  ;;  %s16_s19 = sadd.s32 1, %s649_s19   ;;  %s824_s12 = smov %s625_s13 }
 0x10c   : > { %p13_p7 = scmp.ge.s32.totalorder %s16_s19, 6   ;;  %s825_s13 = smov %s629_s14 }
 0x10d   : > { %s826_s14 = smov %s744_s30  ;;  %s827_s15 = smov %s641_s17 }
 0x10e   : > { %s828_s16 = smov %s645_s18  ;;  %s829_s17 = smov %s832_s22 }
 0x10f   : > { %s830_s18 = smov %s836_s23  ;;  %15 = sbr.rel (!%p13_p7) target bundleno = 5 (0x5), region = 73 }
 0x116   :  { %361 = vsyncpa [#allocation3], 1 }
 0x117   :  { %363 = vsyncpa [#allocation3 + $0x1], 1 }

</bundles_post_ra>
